<compile_context>
chip_gen: v5e
topology: v5e:2x2
jax: 0.10.0
libtpu: 0.0.40
codegen_flags: <defaults>
</compile_context>

<pallas_src>
import math
import functools

import jax
import jax.numpy as jnp
from jax.experimental import pallas as pl
from jax.experimental.pallas import tpu as pltpu


_PALLAS_MIN_FLOPS = 1 << 22              # below this, plain XLA GEMM wins on overhead
_DEFAULT_VMEM_BYTES = 64 * 1024 * 1024   # conservative fallback (v7x per-TC VMEM)


@functools.lru_cache(maxsize=None)
def _vmem_capacity_bytes():
    try:
        return int(pltpu.get_tpu_info().vmem_capacity_bytes)
    except Exception:
        return _DEFAULT_VMEM_BYTES


def _sublane_rows(dtype):
    # Minimum sublane tile: 8 rows for 32-bit, 16 for 16-bit, 32 for 8-bit dtypes.
    return {4: 8, 2: 16, 1: 32}.get(jnp.dtype(dtype).itemsize, 8)


def _round_up(v, mult):
    return ((v + mult - 1) // mult) * mult


def _linear_kernel(x_ref, w_ref, b_ref, o_ref):
    # x_ref: (TM, K)  w_ref: (K, TN)  b_ref: (1, TN)  o_ref: (TM, TN)
    acc = jnp.dot(x_ref[...], w_ref[...], preferred_element_type=jnp.float32)
    o_ref[...] = (acc + b_ref[...].astype(jnp.float32)).astype(o_ref.dtype)


def _plan_tiles(m, k, n, dtype):
    """Pick (tm, nm, tn, nn, vmem_limit) from the chip's actual VMEM capacity."""
    itemsize = jnp.dtype(dtype).itemsize
    sub = _sublane_rows(dtype)
    cap = _vmem_capacity_bytes()
    budget = (cap * 5) // 8            # ~80 MiB on 128-MiB parts, ~40 MiB on v7x
    vmem_limit = (cap * 13) // 16      # scoped limit passed to the compiler
    tm_max = 4096 if cap >= (96 << 20) else 1024

    # Weight residency: keep (K, N) whole & single-buffered when it fits;
    # otherwise tile N (lane-dense slabs) so only a (K, TN) slice is resident.
    tn, nn = n, 1
    if (k * n + n) * itemsize > budget // 2 and n % 128 == 0:
        max_tn = max(((budget // 4) // (k * itemsize)) // 128 * 128, 128)
        tn = min(max_tn, n)
        nn = pl.cdiv(n, tn)
    # TODO(synk): a K-tiled variant with an f32 accumulator scratch would be
    # needed if even a single (K, 128) weight slab exceeded the VMEM budget.

    w_bufs = 1 if nn == 1 else 2                     # single-buffer invariant weight
    resident = w_bufs * (k * tn + tn) * itemsize
    per_row = 2 * (k + tn) * itemsize                # x + out tile, double-buffered
    avail = max(budget - resident, per_row * sub)
    tm_cap = max((min(avail // per_row, tm_max) // sub) * sub, sub)

    if m <= sub:
        tm, nm = m, 1                                # single full-extent block
    else:
        # Balanced tiles; >=2 so both v7x TensorCores get work and DMA overlaps.
        nm = max(pl.cdiv(m, tm_cap), 2)
        tm = min(_round_up(pl.cdiv(m, nm), sub), tm_cap)
        nm = pl.cdiv(m, tm)
    return tm, nm, tn, nn, vmem_limit


@functools.partial(jax.jit, static_argnames=("force_pallas", "use_bf16_matmul"))
def patch_embedding_forward(x, weight, bias, *, force_pallas=False,
                            use_bf16_matmul=False):
    """y = x @ weight + bias  (PyTorch: nn.Linear(input_dim, embedding_dim)).

    x:      (..., input_dim)
    weight: (input_dim, embedding_dim)   [= PyTorch weight.T]
    bias:   (embedding_dim,)
    """
    orig_shape = x.shape
    out_dtype = x.dtype
    k = orig_shape[-1]
    n = weight.shape[1]
    x2d = x.reshape(-1, k)                            # flatten leading dims
    m = x2d.shape[0]

    # Optional bf16 MXU path (f32 accumulation). Numerics tradeoff; off by default.
    if use_bf16_matmul and x2d.dtype == jnp.float32:
        x2d = x2d.astype(jnp.bfloat16)
        weight = weight.astype(jnp.bfloat16)

    # Tiny problems: custom-call + per-step overhead dominates; let XLA handle it.
    if not force_pallas and (2 * m * k * n) < _PALLAS_MIN_FLOPS:
        y = jnp.dot(x2d, weight, preferred_element_type=jnp.float32)
        y = (y + bias.astype(jnp.float32)).astype(out_dtype)
        return y.reshape(*orig_shape[:-1], n)

    itemsize = jnp.dtype(x2d.dtype).itemsize
    tm, nm, tn, nn, vmem_limit = _plan_tiles(m, k, n, x2d.dtype)
    b2d = bias.reshape(1, n)

    if nn == 1:
        # Constant index_map -> single buffer: weight/bias DMA'd once, stay resident.
        w_spec = pl.BlockSpec((k, n), lambda j, i: (0, 0),
                              pipeline_mode=pl.Buffered(1))
        b_spec = pl.BlockSpec((1, n), lambda j, i: (0, 0),
                              pipeline_mode=pl.Buffered(1))
    else:
        w_spec = pl.BlockSpec((k, tn), lambda j, i: (0, j))
        b_spec = pl.BlockSpec((1, tn), lambda j, i: (0, j))

    cost = pl.CostEstimate(
        flops=2 * m * k * n,
        transcendentals=0,
        bytes_accessed=(m * k + k * n + n + m * n) * itemsize,
    )

    # NOTE: grid covers the UNPADDED (m, n) output; Pallas masks the partial
    # last M block.  Safe only because there is no reduction across M rows.
    out = pl.pallas_call(
        _linear_kernel,
        out_shape=jax.ShapeDtypeStruct((m, n), out_dtype),
        grid_spec=pltpu.PrefetchScalarGridSpec(
            num_scalar_prefetch=0,
            grid=(nn, nm),
            in_specs=[
                pl.BlockSpec((tm, k), lambda j, i: (i, 0)),   # x streams over M
                w_spec,                                        # weight resident / N-tiled
                b_spec,                                        # bias resident / N-tiled
            ],
            out_specs=pl.BlockSpec((tm, tn), lambda j, i: (i, j)),
        ),
        compiler_params=pltpu.CompilerParams(
            dimension_semantics=("parallel", "parallel"),      # no reduction axis
            vmem_limit_bytes=int(vmem_limit),
        ),
        cost_estimate=cost,
    )(x2d, weight, b2d)

    return out.reshape(*orig_shape[:-1], n)


def init_patch_embedding_params(key, input_dim, embedding_dim, dtype=jnp.float32):
    """Deterministic init matching nn.Linear default: U(-1/sqrt(in), 1/sqrt(in)).

    Weight is stored as (input_dim, embedding_dim) == PyTorch weight.T.  For best
    store throughput keep embedding_dim a multiple of 128 (lane-dense); otherwise
    pad the columns once here rather than paying masked stores every tile.
    """
    kw, kb = jax.random.split(key)
    bound = 1.0 / math.sqrt(input_dim)
    weight = jax.random.uniform(kw, (input_dim, embedding_dim), dtype,
                                minval=-bound, maxval=bound)
    bias = jax.random.uniform(kb, (embedding_dim,), dtype,
                              minval=-bound, maxval=bound)
    return weight, bias


if __name__ == "__main__":
    key = jax.random.PRNGKey(0)
    kx, kp, kx2, kx3 = jax.random.split(key, 4)

    # Small but lane/MXU-friendly shapes (K, N multiples of 128).
    batch, seq, input_dim, embedding_dim = 2, 8, 128, 256
    weight, bias = init_patch_embedding_params(kp, input_dim, embedding_dim)

    # Small case (m = 16 -> two 8-row tiles, grid sharded across cores).
    x = jax.random.normal(kx, (batch, seq, input_dim), jnp.float32)
    y = jax.block_until_ready(
        patch_embedding_forward(x, weight, bias, force_pallas=True))
    y_ref = x @ weight + bias
    assert y.shape == (batch, seq, embedding_dim)
    assert jnp.allclose(y, y_ref, atol=1e-3, rtol=1e-3)

    # Ragged M (m = 185 -> 96 + 89 rows) exercises the masked partial last block.
    x_rag = jax.random.normal(kx3, (5, 37, input_dim), jnp.float32)
    y_rag = jax.block_until_ready(
        patch_embedding_forward(x_rag, weight, bias, force_pallas=True))
    assert y_rag.shape == (5, 37, embedding_dim)
    assert jnp.allclose(y_rag, x_rag @ weight + bias, atol=1e-3, rtol=1e-3)

    # Larger M (m = 1200 -> balanced 2 x 600-row tiles, no pad/slice HBM passes).
    x_big = jax.random.normal(kx2, (3, 400, input_dim), jnp.float32)
    y_big = jax.block_until_ready(
        patch_embedding_forward(x_big, weight, bias, force_pallas=True))
    assert y_big.shape == (3, 400, embedding_dim)
    assert jnp.allclose(y_big, x_big @ weight + bias, atol=1e-3, rtol=1e-3)

    print("KERNEL_OK")
</pallas_src>

<mosaic_0001>
module attributes {stable_mosaic.version = 11 : i64} {
  func.func @_linear_kernel(%arg0: i32, %arg1: i32, %arg2: memref<8x128xf32, #tpu.memory_space<vmem>>, %arg3: memref<128x256xf32, #tpu.memory_space<vmem>>, %arg4: memref<1x256xf32, #tpu.memory_space<vmem>>, %arg5: memref<8x256xf32, #tpu.memory_space<vmem>>) attributes {dimension_semantics = [#tpu.dimension_semantics<parallel>, #tpu.dimension_semantics<parallel>], iteration_bounds = array<i64: 1, 2>, scalar_prefetch = 0 : i64, scratch_operands = 0 : i64, tpu.core_type = #tpu.core_type<tc>, window_params = [{transform_indices = @transform_0, window_bounds = array<i64: 8, 128>}, {pipeline_mode = #tpu.pipeline_mode<synchronous>, transform_indices = @transform_1, window_bounds = array<i64: 128, 256>}, {pipeline_mode = #tpu.pipeline_mode<synchronous>, transform_indices = @transform_2, window_bounds = array<i64: 1, 256>}, {transform_indices = @transform_3, window_bounds = array<i64: 8, 256>}]} {
    %c0 = arith.constant 0 : index
    %c0_0 = arith.constant 0 : index
    %0 = vector.load %arg2[%c0, %c0_0] : memref<8x128xf32, #tpu.memory_space<vmem>>, vector<8x128xf32>
    %c0_1 = arith.constant 0 : index
    %c0_2 = arith.constant 0 : index
    %1 = vector.load %arg3[%c0_1, %c0_2] : memref<128x256xf32, #tpu.memory_space<vmem>>, vector<128x256xf32>
    %cst = arith.constant dense<0.000000e+00> : vector<8x256xf32>
    %2 = tpu.matmul %0, %1, %cst {dimension_numbers = #tpu.dot_dimension_numbers<[1], [0], [0], [1], [0, 0, 1, 1], [], []>} : vector<8x128xf32>, vector<128x256xf32>, vector<8x256xf32> -> vector<8x256xf32>
    %c0_3 = arith.constant 0 : index
    %c0_4 = arith.constant 0 : index
    %3 = vector.load %arg4[%c0_3, %c0_4] : memref<1x256xf32, #tpu.memory_space<vmem>>, vector<1x256xf32>
    %4 = vector.broadcast %3 : vector<1x256xf32> to vector<8x256xf32>
    %5 = arith.addf %2, %4 : vector<8x256xf32>
    %c0_5 = arith.constant 0 : index
    %c0_6 = arith.constant 0 : index
    %6 = vector.load %arg5[%c0_5, %c0_6] : memref<8x256xf32, #tpu.memory_space<vmem>>, vector<8x256xf32>
    tpu.vector_store %arg5[%c0_5, %c0_6], %5 {strides = array<i32>} : memref<8x256xf32, #tpu.memory_space<vmem>>, vector<8x256xf32>,
    return
  }
  func.func @transform_0(%arg0: i32, %arg1: i32) -> (i32, i32) {
    %c0_i32 = arith.constant 0 : i32
    %c0_i32_0 = arith.constant 0 : i32
    return %arg1, %c0_i32 : i32, i32
  }
  func.func @transform_1(%arg0: i32, %arg1: i32) -> (i32, i32) {
    %c0_i32 = arith.constant 0 : i32
    %c0_i32_0 = arith.constant 0 : i32
    %c0_i32_1 = arith.constant 0 : i32
    return %c0_i32, %c0_i32_0 : i32, i32
  }
  func.func @transform_2(%arg0: i32, %arg1: i32) -> (i32, i32) {
    %c0_i32 = arith.constant 0 : i32
    %c0_i32_0 = arith.constant 0 : i32
    %c0_i32_1 = arith.constant 0 : i32
    return %c0_i32, %c0_i32_0 : i32, i32
  }
  func.func @transform_3(%arg0: i32, %arg1: i32) -> (i32, i32) {
    %c0_i32 = arith.constant 0 : i32
    return %arg1, %arg0 : i32, i32
  }
}

</mosaic_0001>

<bundles_post_ra>
// kernel: patch_embedding_forward.1
= control target key start
LH: loop header
LB: loop body
LE: loop exit
PB: predicated region body
PF: predicated region fallthrough
CT: control target
= control target key end

     0   :  { %8 = vsyncpa [#allocation3], 0  ;;  %s824_s0 = inlined_call_operand.hbm [shape: f32[16,128], index: 0, kind: input, shape index: {}]   ;;  %s825_s1 = inlined_call_operand.hbm [shape: f32[128,256], index: 1, kind: input, shape index: {}]   ;;  %s826_s2 = inlined_call_operand.vmem [shape: f32[1,256], index: 2, kind: input, shape index: {}]   ;;  %s827_s3 = inlined_call_operand.hbm [shape: f32[16,256], index: 3, kind: output, shape index: {}]  }
   0x1   :  { %10 = vsyncpa [#allocation3 + $0x1], 0 }
   0x2   :  { %11 = vsyncpa [#allocation6], 0 }
   0x3   :  { %12 = vsyncpa [#allocation4], 0 }
   0x4   :  { %14 = vsyncpa [#allocation4 + $0x1], 0  ;;  %s674_s12 = smov 0   ;;  %s676_s13 = smov 0  }
   0x5   :  { %s678_s14 = smov 0   ;;  %s680_s15 = smov 0  }
   0x6   :  { %s682_s16 = smov 0   ;;  %s684_s17 = smov 0  }
   0x7 LB: > { %s411_s18 = sadd.s32 4294967295, %s649_s17   ;;  %p413_p0 = scmp.ge.s32.totalorder %s649_s17, 1  ;;  %s649_s17 = sphi %s684_s17, %s20_s17   ;;  %s645_s16 = sphi %s682_s16, %s838_s16   ;;  %s641_s15 = sphi %s680_s15, %s837_s15   ;;  %s637_s14 = sphi %s678_s14, %s836_s14   ;;  %s633_s13 = sphi %s676_s13, %s835_s13   ;;  %s629_s12 = sphi %s674_s12, %s834_s12  }
   0x8   : > { %p706_p1 = scmp.eq.s32.totalorder %s411_s18, 0  ;;  %p133_p2 = scmp.lt.s32.totalorder %s649_s17, 3 }
   0x9   : > { %s144_s22 = sshll.u32 %s825_s1, 4  ;;  %s651_s24 = smov [#allocation5]   ;;  %s145_s22 = int_to_ptr.hbm [resolvable:$true] %s144_s22 }
   0xa   : > { %p714_p3 = pnand %p413_p0, %p133_p2  ;;  %s146_s25 = sshll.u32 %s651_s24, 4  ;;  %s147_s25 = int_to_ptr.vmem [resolvable:$true] %s146_s25 }
   0xb   : > { %p415_p6 = scmp.ge.s32.totalorder %s649_s17, 2  ;;  %s652_s26 = smov 256  }
   0xc   : > { %p436_p4 = pneg %p714_p3  ;;  %s653_s27 = smov 16  }
   0xd   : > { %s412_s28 = sadd.s32 4294967294, %s649_s17   ;;  %s29_s29 = sadd.s32 1, %s645_s16 }
   0xe   : > { %p437_p5 = pnand %p436_p4, %p706_p1  ;;  %s39_s30 = sadd.s32 1, %s637_s14 }
   0xf   : > { %p30_p7 = scmp.ge.s32.totalorder %s29_s29, 2  ;;  %p46_p8 = scmp.ne.s32.totalorder %s637_s14, %s633_s13 }
  0x10   : > { %439 = dma.hbm_to_vmem [thread:$0]  (!%p437_p5), %s145_s22, 4096, %s147_s25, [#allocation6], %s652_s26, %s652_s26, %s653_s27  }
  0x11   : > { %p47_p9 = scmp.eq.s32.totalorder %s649_s17, 0  ;;  %p52_p10 = scmp.ne.s32.totalorder %s633_s13, %s629_s12 }
  0x12   : > { %s840_s29 = smov (%p30_p7, %s29_s29), 0  ;;  %p120_p13 = scmp.eq.s32.totalorder %s411_s18, 1 }
  0x13   : > { %p733_p11 = por %p47_p9, %p46_p8  ;;  %p739_p12 = por %p706_p1, %p52_p10 }
  0x14   : > { %s36_s6 = ssub.s32 %s645_s16, %s840_s29  ;;  %p126_p2 = scmp.eq.s32.totalorder %s412_s28, 1 }
  0x15   : > { %p37_p0 = scmp.eq.s32.totalorder %s36_s6, 0  ;;  %p745_p4 = por %p120_p13, %p46_p8 }
  0x16   : > { %p449_p5 = scmp.lt.s32.totalorder %s649_s17, 2  ;;  %p753_p7 = por %p126_p2, %p52_p10 }
  0x17   : > { %s751_s8 = scalar_select %p37_p0, %s637_s14, %s39_s30  }
  0x18   : > { %s163_s10 = sand.u32 1, %s637_s14   ;;  %s417_s20 = sshll.u32 %s645_s16, 3 }
  0x19   : > { %s416_s11 = sshll.u32 %s163_s10, 3  ;;  %s171_s18 = scalar_lea.hbm %s824_s0, %s417_s20 }
  0x1a   : > { %s167_s24 = scalar_lea.vmem [#allocation2], %s416_s11  ;;  %s173_s26 = sshll.u32 %s171_s18, 4  ;;  %s174_s26 = int_to_ptr.hbm [resolvable:$true] %s173_s26 }
  0x1b   : > { %s175_s25 = sshll.u32 %s167_s24, 4  ;;  %p441_p8 = pnand %p449_p5, %p733_p11  ;;  %s176_s25 = int_to_ptr.vmem [resolvable:$true] %s175_s25 }
  0x1c   : > { %s164_s27 = scalar_lea.sflag [#allocation3], %s163_s10  ;;  %184 = sbr.rel (%p714_p3) target bundleno = 200 (0xc8), region = 32 }
  0x1d   : > { %443 = dma.hbm_to_vmem [thread:$0]  (!%p441_p8), %s174_s26, 128, %s176_s25, %s164_s27  }
  0x1e   : > { %s767_s28 = sand.u32 (!%p714_p3), 1, %s633_s13  }
  0x1f   : > { %s419_s30 = sshll.u32 (!%p714_p3), %s767_s28, 3  ;;  %s187_s6 = scalar_lea.sflag (!%p714_p3), [#allocation3], %s767_s28 }
  0x20   : > { %s771_s11 = scalar_lea.vmem (!%p714_p3), [#allocation2], %s419_s30 }
  0x21   : > { %616 = dma.done.wait (%p739_p12), %s187_s6, 128  }
  0x22   : > { %618 = vsyncadd (%p739_p12), %s187_s6, 4294967168 }
  0x23   : > { %620 = dma.done.wait (%p706_p1), [#allocation6], 4096  }
  0x24   : > { %622 = vsyncadd (%p706_p1), [#allocation6], 4294963200  ;;  %v251_v0 = vld [vmem:[#allocation5 + $0xf0] sm:$0xff]  ;;  %v252_v1 = vld [vmem:[#allocation5 + $0xf8] sm:$0xff]  ;;  %s421_s19 = sshll.u32 %s767_s28, 4  ;;  %s427_s23 = sshll.u32 %s641_s15, 4 }
  0x25   : > { %v249_v2 = vld [vmem:[#allocation5 + $0xe0] sm:$0xff]  ;;  %259 = vmatpush.msra.mxu0 %v251_v0  ;;  %279 = vmatpush.msra.mxu1 %v252_v1  ;;  %v250_v3 = vld [vmem:[#allocation5 + $0xe8] sm:$0xff]  ;;  %v247_v4 = vld [vmem:[#allocation5 + $0xd0] sm:$0xff]  ;;  %s315_s21 = scalar_lea.hbm %s827_s3, %s427_s23  ;;  %s218_s22 = scalar_lea.vmem [#allocation7], %s421_s19 }
  0x26   : > { %v248_v5 = vld [vmem:[#allocation5 + $0xd8] sm:$0xff]  ;;  %v245_v6 = vld [vmem:[#allocation5 + $0xc0] sm:$0xff]  ;;  %v246_v7 = vld [vmem:[#allocation5 + $0xc8] sm:$0xff]  ;;  %s317_s18 = sshll.u32 %s218_s22, 4  ;;  %s319_s24 = sshll.u32 %s315_s21, 4  ;;  %s318_s18 = int_to_ptr.vmem [resolvable:$true] %s317_s18  ;;  %s320_s24 = int_to_ptr.hbm [resolvable:$true] %s319_s24 }
  0x27   : > { %260 = vmatpush.msra.mxu0 %v249_v2  ;;  %280 = vmatpush.msra.mxu1 %v250_v3  ;;  %v243_v8 = vld [vmem:[#allocation5 + $0xb0] sm:$0xff]  ;;  %v244_v9 = vld [vmem:[#allocation5 + $0xb8] sm:$0xff]  ;;  %v241_v10 = vld [vmem:[#allocation5 + $0xa0] sm:$0xff]  ;;  %s302_s15 = scalar_lea.sflag [#allocation4], %s767_s28  ;;  %s577_s25 = sshra.s32 %s320_s24, 4  ;;  %s578_s25 = int_to_ptr.hbm [resolvable:$true] %s577_s25 }
  0x28   : > { %v242_v11 = vld [vmem:[#allocation5 + $0xa8] sm:$0xff]  ;;  %v239_v12 = vld [vmem:[#allocation5 + $0x90] sm:$0xff]  ;;  %v240_v13 = vld [vmem:[#allocation5 + $0x98] sm:$0xff]  ;;  %s579_s26 = scalar_lea.hbm %s578_s25, 16  ;;  %s583_s6 = scalar_lea.hbm %s827_s3, 32 }
  0x29   : > { %261 = vmatpush.msra.mxu0 %v247_v4  ;;  %281 = vmatpush.msra.mxu1 %v248_v5  ;;  %v237_v14 = vld [vmem:[#allocation5 + $0x80] sm:$0xff]  ;;  %v238_v15 = vld [vmem:[#allocation5 + $0x88] sm:$0xff]  ;;  %v235_v16 = vld [vmem:[#allocation5 + $0x70] sm:$0xff]  ;;  %p580_p1 = scmp.ne.s32.totalorder %s578_s25, %s579_s26  ;;  %p584_p10 = scmp.lt.s32.totalorder %s578_s25, %s827_s3 }
  0x2a   : > { %v236_v17 = vld [vmem:[#allocation5 + $0x78] sm:$0xff]  ;;  %v233_v18 = vld [vmem:[#allocation5 + $0x60] sm:$0xff]  ;;  %v234_v19 = vld [vmem:[#allocation5 + $0x68] sm:$0xff]  ;;  %p585_p11 = scmp.lt.s32.totalorder %s583_s6, %s579_s26 }
  0x2b   : > { %262 = vmatpush.msra.mxu0 %v245_v6  ;;  %282 = vmatpush.msra.mxu1 %v246_v7  ;;  %v231_v20 = vld [vmem:[#allocation5 + $0x50] sm:$0xff]  ;;  %v232_v21 = vld [vmem:[#allocation5 + $0x58] sm:$0xff]  ;;  %v229_v22 = vld [vmem:[#allocation5 + $0x40] sm:$0xff]  ;;  %p581_p3 = pnand %p580_p1, %p745_p4 }
  0x2c   : > { %v230_v23 = vld [vmem:[#allocation5 + $0x48] sm:$0xff]  ;;  %v227_v24 = vld [vmem:[#allocation5 + $0x30] sm:$0xff]  ;;  %v228_v25 = vld [vmem:[#allocation5 + $0x38] sm:$0xff]  ;;  %p586_p12 = por %p585_p11, %p584_p10 }
  0x2d   : > { %263 = vmatpush.msra.mxu0 %v243_v8  ;;  %283 = vmatpush.msra.mxu1 %v244_v9  ;;  %v225_v26 = vld [vmem:[#allocation5 + $0x20] sm:$0xff]  ;;  %v226_v27 = vld [vmem:[#allocation5 + $0x28] sm:$0xff]  ;;  %v223_v28 = vld [vmem:[#allocation5 + $0x10] sm:$0xff]  ;;  %p582_p9 = pneg %p581_p3 }
  0x2e   : > { %v224_v29 = vld [vmem:[#allocation5 + $0x18] sm:$0xff]  ;;  %v221_v30 = vld [vmem:[#allocation5] sm:$0xff]  ;;  %v222_v31 = vld [vmem:[#allocation5 + $0x8] sm:$0xff] }
  0x2f   : > { %264 = vmatpush.msra.mxu0 %v241_v10  ;;  %284 = vmatpush.msra.mxu1 %v242_v11  ;;  %v220_v32 = vld [vmem:[%s771_s11] sm:$0xff]  ;;  %p587_p13 = pnand %p586_p12, %p582_p9 }
  0x30   : > { %v253_v33 = vld [vmem:[%s826_s2] sm:$0x3] }
  0x31   : > { %265 = vmatpush.msra.mxu0 %v239_v12  ;;  %285 = vmatpush.msra.mxu1 %v240_v13  ;;  %v255_v34 = vperm.slane %v253_v33, 0  ;;  %v256_v35 = vperm.slane %v253_v33, 1 }
  0x33   : > { %266 = vmatpush.msra.mxu0 %v237_v14  ;;  %286 = vmatpush.msra.mxu1 %v238_v15 }
  0x35   : > { %267 = vmatpush.msra.mxu0 %v235_v16  ;;  %287 = vmatpush.msra.mxu1 %v236_v17 }
  0x37   : > { %268 = vmatpush.msra.mxu0 %v233_v18  ;;  %288 = vmatpush.msra.mxu1 %v234_v19 }
  0x39   : > { %269 = vmatpush.msra.mxu0 %v231_v20  ;;  %289 = vmatpush.msra.mxu1 %v232_v21 }
  0x3b   : > { %270 = vmatpush.msra.mxu0 %v229_v22  ;;  %290 = vmatpush.msra.mxu1 %v230_v23 }
  0x3d   : > { %271 = vmatpush.msra.mxu0 %v227_v24  ;;  %291 = vmatpush.msra.mxu1 %v228_v25 }
  0x3f   : > { %272 = vmatpush.msra.mxu0 %v225_v26  ;;  %292 = vmatpush.msra.mxu1 %v226_v27 }
  0x41   : > { %273 = vmatpush.msra.mxu0 %v223_v28  ;;  %293 = vmatpush.msra.mxu1 %v224_v29 }
  0x43   : > { %274 = vmatpush.msra.mxu0 %v221_v30  ;;  %294 = vmatpush.msra.mxu1 %v222_v31 }
  0x44   : > { %275 = vmatmul.f32.vlgmr.msra.gmra.mxu0 %v220_v32  ;;  %295 = vmatmul.f32.vlgmr.msra.gmra.mxu1 %v220_v32 }
  0xc1   : > { %v276_v36 = vpop.f32.mrf.mxu0  ;;  %v296_v37 = vpop.f32.mrf.mxu1 }
  0xc2   : > { %v277_v38 = vadd.f32 %v276_v36, %v255_v34  ;;  %v297_v39 = vadd.f32 %v296_v37, %v256_v35 }
  0xc4   : > { %299 = vst [vmem:[%s218_s22] sm:$0xff] %v277_v38 }
  0xc5   : > { %300 = vst [vmem:[%s218_s22 + $0x8] sm:$0xff] %v297_v39 }
  0xc6   : > { %590 = shalt.err (!%p587_p13)
}
  0xc7   : > { %434 = dma.vmem_to_hbm [thread:$0]  (%p745_p4), %s318_s18, 256, %s320_s24, %s302_s15  }
  0xc8 PF: > { %s331_s28 = sand.u32 1, %s629_s12   ;;  %p445_p0 = pnand %p415_p6, %p753_p7 }
  0xc9   : > { %s332_s23 = scalar_lea.sflag [#allocation4], %s331_s28 }
  0xca   : > { %p446_p2 = pneg %p445_p0 }
  0xcc   : > { %624 = dma.done.wait (%p446_p2), %s332_s23, 256  }
  0xcd   : > { %626 = vsyncadd (%p446_p2), %s332_s23, 4294967040  ;;  %s20_s17 = sadd.s32 1, %s649_s17   ;;  %s834_s12 = smov %s633_s13 }
  0xce   : > { %p17_p5 = scmp.ge.s32.totalorder %s20_s17, 4   ;;  %s835_s13 = smov %s637_s14 }
  0xcf   : > { %s836_s14 = smov %s751_s8  ;;  %s837_s15 = smov %s645_s16 }
  0xd0   : > { %s838_s16 = smov %s840_s29  ;;  %19 = sbr.rel (!%p17_p5) target bundleno = 7 (0x7), region = 81 }
  0xd5   :  { %338 = vsyncpa [#allocation3], 1 }
  0xd6   :  { %340 = vsyncpa [#allocation3 + $0x1], 1 }
  0xd7   :  { %341 = vsyncpa [#allocation6], 1 }
  0xd8   :  { %342 = vsyncpa [#allocation4], 1 }
  0xd9   :  { %344 = vsyncpa [#allocation4 + $0x1], 1 }

</bundles_post_ra>
